<compile_context>
chip_gen: v5e
topology: v5e:2x2
jax: 0.10.0
libtpu: 0.0.40
codegen_flags: <defaults>
</compile_context>

<pallas_src>
import jax
import jax.numpy as jnp
from jax.experimental import pallas as pl
from jax.experimental.pallas import tpu as pltpu


def _identity_copy_kernel(x_ref, z_ref):
    # Elementwise identity copy of the current (bb, bf) tile.
    z_ref[...] = x_ref[...]


def _choose_blocks(batch, feat, itemsize):
    """Pick a lane-dense (bb, bf) block of ~<= 4 MiB respecting the (8,128) rule."""
    # Feature (lane) axis: large multiple of 128 pipelines best; if feat is not
    # 128-aligned the block must span the full dim.
    if feat % 128 == 0:
        bf = min(feat, 2048)
    else:
        bf = feat

    # Batch (sublane) axis: multiple of 8, or the full extent when small /
    # not 8-aligned.  Cap block bytes at ~4 MiB so double-buffered in+out
    # streams stay far below the 32 MiB scoped / 64 MiB physical VMEM on v7x
    # (and the 16 MiB default on v5e).
    max_bb = max(1, (4 * 1024 * 1024) // max(1, bf * itemsize))
    if batch % 8 == 0 and batch > max_bb:
        bb = max(8, (max_bb // 8) * 8)
    else:
        bb = batch
    return bb, bf


def identity_transform_forward(x, context=None, extra_context=None):
    """Pallas implementation of IdentityTransform.forward.

    Args:
        x: (batch, ...) array (e.g. NCHW image tensor).
    Returns:
        z: same shape/dtype as x (identity copy, aliased onto the input buffer).
        ldj: (batch,) float32 zeros (the `0` log-likelihood contribution).
    """
    batch = x.shape[0]
    feat = 1
    for d in x.shape[1:]:
        feat *= d
    feat = max(feat, 1)

    # Contiguity-preserving flatten to a lane-dense 2-D slab.
    x2d = x.reshape(batch, feat)

    itemsize = jnp.dtype(x.dtype).itemsize
    bb, bf = _choose_blocks(batch, feat, itemsize)
    grid = (pl.cdiv(batch, bb), pl.cdiv(feat, bf))

    z2d = pl.pallas_call(
        _identity_copy_kernel,
        out_shape=jax.ShapeDtypeStruct((batch, feat), x.dtype),
        grid=grid,
        in_specs=[pl.BlockSpec((bb, bf), lambda i, j: (i, j))],
        out_specs=pl.BlockSpec((bb, bf), lambda i, j: (i, j)),
        # Reuse the input HBM buffer for the identity output; under a donating
        # jit this makes the "copy" allocation-free.
        input_output_aliases={0: 0},
        compiler_params=pltpu.CompilerParams(
            dimension_semantics=("parallel", "parallel")),
    )(x2d)

    z = z2d.reshape(x.shape)
    # Constant zero log-det-Jacobian: cheaper as plain JAX than as a masked
    # (batch, 1) kernel store.
    ldj = jnp.zeros((batch,), jnp.float32)
    return z, ldj


if __name__ == "__main__":
    key = jax.random.PRNGKey(0)
    # Small NCHW input consistent with a flow transform on images.
    x = jax.random.normal(key, (2, 4, 16, 16), dtype=jnp.float32)

    z, ldj = identity_transform_forward(x)
    jax.block_until_ready((z, ldj))

    assert z.shape == x.shape and z.dtype == x.dtype
    assert ldj.shape == (x.shape[0],) and ldj.dtype == jnp.float32
    assert bool(jnp.all(z == x))
    assert bool(jnp.all(ldj == 0.0))

    print("KERNEL_OK")
</pallas_src>

<mosaic_0001>
module attributes {stable_mosaic.version = 11 : i64} {
  func.func @_identity_copy_kernel(%arg0: i32, %arg1: i32, %arg2: memref<2x1024xf32, #tpu.memory_space<vmem>>, %arg3: memref<2x1024xf32, #tpu.memory_space<vmem>>) attributes {dimension_semantics = [#tpu.dimension_semantics<parallel>, #tpu.dimension_semantics<parallel>], iteration_bounds = array<i64: 1, 1>, scalar_prefetch = 0 : i64, scratch_operands = 0 : i64, tpu.core_type = #tpu.core_type<tc>, window_params = [{transform_indices = @transform_0, window_bounds = array<i64: 2, 1024>}, {transform_indices = @transform_1, window_bounds = array<i64: 2, 1024>}]} {
    %c0 = arith.constant 0 : index
    %c0_0 = arith.constant 0 : index
    %0 = vector.load %arg2[%c0, %c0_0] : memref<2x1024xf32, #tpu.memory_space<vmem>>, vector<2x1024xf32>
    %c0_1 = arith.constant 0 : index
    %c0_2 = arith.constant 0 : index
    %1 = vector.load %arg3[%c0_1, %c0_2] : memref<2x1024xf32, #tpu.memory_space<vmem>>, vector<2x1024xf32>
    tpu.vector_store %arg3[%c0_1, %c0_2], %0 {strides = array<i32>} : memref<2x1024xf32, #tpu.memory_space<vmem>>, vector<2x1024xf32>,
    return
  }
  func.func @transform_0(%arg0: i32, %arg1: i32) -> (i32, i32) {
    %c0_i32 = arith.constant 0 : i32
    return %arg0, %arg1 : i32, i32
  }
  func.func @transform_1(%arg0: i32, %arg1: i32) -> (i32, i32) {
    %c0_i32 = arith.constant 0 : i32
    return %arg0, %arg1 : i32, i32
  }
}

</mosaic_0001>

<bundles_post_ra>
// kernel: tpu_custom_call.1
= control target key start
LH: loop header
LB: loop body
LE: loop exit
PB: predicated region body
PF: predicated region fallthrough
CT: control target
= control target key end

     0   :  { %6 = vsyncpa [#allocation3], 0  ;;  %s116_s0 = inlined_call_operand.hbm [shape: f32[2,1024], index: 0, kind: input, shape index: {}, may-alias: {0,1}]   ;;  %s117_s1 = inlined_call_operand.hbm [shape: f32[2,1024], index: 1, kind: output, shape index: {}, may-alias: {0,1}]  }
   0x1   :  { %7 = vsyncpa [#allocation4], 0  ;;  %s13_s8 = sshll.u32 %s116_s0, 4  ;;  %s98_s9 = smov [#allocation2]   ;;  %s14_s8 = int_to_ptr.hbm [resolvable:$true] %s13_s8 }
   0x2   :  { %s15_s10 = sshll.u32 %s98_s9, 4  ;;  %s16_s10 = int_to_ptr.vmem [resolvable:$true] %s15_s10 }
   0x3   :  { %18 = dma.hbm_to_vmem [thread:$0]  %s14_s8, 256, %s16_s10, [#allocation3]  }
   0x4   :  { %94 = dma.done.wait [#allocation3], 256  }
   0x5   :  { %95 = vsyncadd [#allocation3], 4294967040  ;;  %s99_s11 = smov [#allocation5]   ;;  %s34_s15 = sshll.u32 %s117_s1, 4  ;;  %v23_v0 = vld [vmem:[#allocation2] sm:$0xff]  ;;  %v24_v1 = vld [vmem:[#allocation2 + $0x8] sm:$0xff]  ;;  %s35_s15 = int_to_ptr.hbm [resolvable:$true] %s34_s15 }
   0x6   :  { %s32_s12 = sshll.u32 %s99_s11, 4  ;;  %25 = vst [vmem:[#allocation5] sm:$0xff] %v23_v0  ;;  %s33_s12 = int_to_ptr.vmem [resolvable:$true] %s32_s12 }
   0x7   :  { %26 = vst [vmem:[#allocation5 + $0x8] sm:$0xff] %v24_v1 }
   0x8   :  { %37 = dma.vmem_to_hbm [thread:$0]  %s33_s12, 256, %s35_s15, [#allocation4]  }
   0x9   :  { %96 = dma.done.wait [#allocation4], 256  }
   0xa   :  { %97 = vsyncadd [#allocation4], 4294967040 }
   0xb   :  { %42 = vsyncpa [#allocation3], 1 }
   0xc   :  { %43 = vsyncpa [#allocation4], 1 }

</bundles_post_ra>
